<compile_context>
chip_gen: v7x
topology: tpu7x:2x2x1
jax: 0.10.0
libtpu: 0.0.40
codegen_flags: <defaults>
</compile_context>

<pallas_src>
import jax
import jax.numpy as jnp
from jax.experimental import pallas as pl
from jax.experimental.pallas import tpu as pltpu

_LANES = 512                          # lane-dense tile width (multiple of 128)
_ROW_TILE = 1024                      # 1024 * 512 * 4 B = 2 MiB per block buffer
_SMALL_ELEMS = _ROW_TILE * _LANES     # <= one block -> whole-array fast path


def _span_mask_kernel(starts_ref, mask_ref):
    # starts_ref: int block in VMEM; mask_ref: float32 block in VMEM.
    mask_ref[...] = (starts_ref[...] >= 0).astype(jnp.float32)


def enum_span_finder_forward(sequence_tensor, sequence_mask, span_indices, span=None):
    """Pallas implementation of EnumSpanFinder.forward.

    Returns a dict mirroring the torch module's Dict[str, Any] output.
    """
    B, N, _ = span_indices.shape
    total = B * N

    # TODO(synk): accepting `starts` as a standalone (B, N) int32 array (or a
    # (B, 2, N) layout) would avoid this strided size-2-minor-dim column
    # extraction copy in XLA; the module interface forces (B, N, 2) here.
    starts = span_indices[:, :, 0]

    if total <= _SMALL_ELEMS:
        # Fast path: single full-extent block, natural (B, N) layout, no grid,
        # no padding, no reshapes.
        span_mask = pl.pallas_call(
            _span_mask_kernel,
            out_shape=jax.ShapeDtypeStruct((B, N), jnp.float32),
        )(starts)
    else:
        # Tiled lane-dense path with a ragged last block.
        lanes = _LANES
        rows = pl.cdiv(total, lanes)
        padded = rows * lanes
        flat = starts.reshape(-1)
        if padded != total:
            # < `lanes` padded elements; their outputs are sliced away below.
            flat = jnp.pad(flat, (0, padded - total))
        starts2d = flat.reshape(rows, lanes)

        grid = (pl.cdiv(rows, _ROW_TILE),)
        # in + out, double-buffered, 4 bytes/elem each, plus slack.
        vmem_bytes = 2 * 2 * _ROW_TILE * lanes * 4 + (1 << 20)

        mask2d = pl.pallas_call(
            _span_mask_kernel,
            out_shape=jax.ShapeDtypeStruct((rows, lanes), jnp.float32),
            grid=grid,
            in_specs=[pl.BlockSpec((_ROW_TILE, lanes), lambda i: (i, 0))],
            out_specs=pl.BlockSpec((_ROW_TILE, lanes), lambda i: (i, 0)),
            compiler_params=pltpu.CompilerParams(
                dimension_semantics=("parallel",),
                vmem_limit_bytes=vmem_bytes,
            ),
        )(starts2d)
        span_mask = mask2d.reshape(-1)[:total].reshape(B, N)

    # torch's .squeeze(-1) only changes the shape when num_spans == 1.
    if N == 1:
        span_mask = span_mask.reshape(B)

    # TODO(synk): the reference module's __init__ raises NotImplemented and the
    # rest of its forward body is undefined; only span_mask is computed.
    return {"span_mask": span_mask}


if __name__ == "__main__":
    key = jax.random.PRNGKey(0)
    k1, k2, k3 = jax.random.split(key, 3)

    batch, seq_len, hidden, num_spans = 2, 16, 32, 8

    sequence_tensor = jax.random.normal(k1, (batch, seq_len, hidden), dtype=jnp.float32)
    sequence_mask = jnp.ones((batch, seq_len), dtype=jnp.float32)

    # Random spans; mark some spans as padding with start index -1.
    starts = jax.random.randint(k2, (batch, num_spans), 0, seq_len, dtype=jnp.int32)
    ends = jnp.clip(starts + jax.random.randint(k3, (batch, num_spans), 0, 4,
                                                dtype=jnp.int32), 0, seq_len - 1)
    pad = (jnp.arange(num_spans)[None, :] >= jnp.array([[5], [6]]))  # last spans padded
    starts = jnp.where(pad, jnp.int32(-1), starts)
    span_indices = jnp.stack([starts, ends], axis=-1).astype(jnp.int32)  # (B, N, 2)

    # Small-shape fast path.
    out = enum_span_finder_forward(sequence_tensor, sequence_mask, span_indices)
    span_mask = jax.block_until_ready(out["span_mask"])
    ref = (span_indices[:, :, 0] >= 0).astype(jnp.float32)
    assert span_mask.shape == ref.shape
    assert bool(jnp.all(span_mask == ref))

    # Larger case exercising the tiled path: ragged grid (2 steps, partial last
    # block) and lane-remainder padding.
    b2, n2 = 3, 180000
    k4, k5 = jax.random.split(k3)
    s2 = jax.random.randint(k4, (b2, n2), -2, seq_len, dtype=jnp.int32)
    e2 = jnp.clip(s2 + 1, 0, seq_len - 1)
    si2 = jnp.stack([s2, e2], axis=-1).astype(jnp.int32)
    st2 = jax.random.normal(k5, (b2, seq_len, hidden), dtype=jnp.float32)
    sm2 = jnp.ones((b2, seq_len), dtype=jnp.float32)
    out2 = enum_span_finder_forward(st2, sm2, si2)
    mask2 = jax.block_until_ready(out2["span_mask"])
    ref2 = (si2[:, :, 0] >= 0).astype(jnp.float32)
    assert mask2.shape == ref2.shape
    assert bool(jnp.all(mask2 == ref2))

    print("KERNEL_OK")
</pallas_src>

<mosaic_0001>
module attributes {stable_mosaic.version = 11 : i64} {
  func.func @_span_mask_kernel(%arg0: memref<2x8xi32, #tpu.memory_space<vmem>>, %arg1: memref<2x8xf32, #tpu.memory_space<vmem>>) attributes {dimension_semantics = [], scalar_prefetch = 0 : i64, scratch_operands = 0 : i64, tpu.core_type = #tpu.core_type<tc>} {
    %c0 = arith.constant 0 : index
    %c0_0 = arith.constant 0 : index
    %0 = vector.load %arg0[%c0, %c0_0] : memref<2x8xi32, #tpu.memory_space<vmem>>, vector<2x8xi32>
    %c0_i32 = arith.constant 0 : i32
    %1 = vector.broadcast %c0_i32 : i32 to vector<2x8xi32>
    %2 = arith.cmpi sge, %0, %1 : vector<2x8xi32>
    %3 = arith.extui %2 : vector<2x8xi1> to vector<2x8xi32>
    %4 = arith.sitofp %3 : vector<2x8xi32> to vector<2x8xf32>
    %c0_1 = arith.constant 0 : index
    %c0_2 = arith.constant 0 : index
    %5 = vector.load %arg1[%c0_1, %c0_2] : memref<2x8xf32, #tpu.memory_space<vmem>>, vector<2x8xf32>
    tpu.vector_store %arg1[%c0_1, %c0_2], %4 {strides = array<i32>} : memref<2x8xf32, #tpu.memory_space<vmem>>, vector<2x8xf32>,
    return
  }
}

</mosaic_0001>

<bundles_post_ra>
// kernel: tpu_custom_call.1
= control target key start
LH: loop header
LB: loop body
LE: loop exit
PB: predicated region body
PF: predicated region fallthrough
CT: control target
= control target key end

     0   :  { %6 = vsyncpa [#allocation3], 0  ;;  %s131_s0 = inlined_call_operand.hbm [shape: s32[2,8], index: 0, kind: input, shape index: {}]   ;;  %s132_s1 = inlined_call_operand.hbm [shape: f32[2,8], index: 1, kind: output, shape index: {}]  }
   0x1   :  { %7 = vsyncpa [#allocation4], 0  ;;  %s94_s6 = smov [#allocation2]   ;;  %s46_s10 = scalar_lea.hbm %s131_s0, 32 }
   0x2   :  { %s14_s7 = sshll.u32 %s94_s6, 4  ;;  %p47_p0 = scmp.ne.s32.totalorder %s131_s0, %s46_s10  ;;  %s15_s7 = int_to_ptr.vmem [resolvable:$true] %s14_s7 }
   0x3   :  { %p50_p1 = scmp.lt.u32.totalorder %s46_s10, %s131_s0 }
   0x5   :  { %p52_p2 = pnand %p50_p1, %p47_p0 }
   0x7   :  { %55 = shalt.err (!%p52_p2)
}
   0x8   :  { %s56_s15 = scalar_lea.vmem %s15_s7, 32  ;;  %p61_p4 = scmp.lt.s32.totalorder %s15_s7, %s15_s7 }
   0x9   :  { %p57_p3 = scmp.ne.s32.totalorder %s15_s7, %s56_s15  ;;  %p62_p5 = scmp.lt.s32.totalorder %s56_s15, %s56_s15 }
   0xb   :  { %p63_p6 = por %p62_p5, %p61_p4 }
   0xd   :  { %p64_p7 = pnand %p63_p6, %p57_p3 }
   0xf   :  { %67 = shalt.err (!%p64_p7)
}
  0x10   :  { %17 = dma.hbm_to_vmem [thread:$0]  %s131_s0, 32, %s15_s7, [#allocation3]  }
  0x11   :  { %90 = dma.done.wait [#allocation3], 32  }
  0x12   :  { %91 = vsyncadd [#allocation3], 4294967264  ;;  %s95_s18 = smov [#allocation5]   ;;  %v21_v0 = vld [vmem:[#allocation2] sm:$0x3]  ;;  %vm25_vm0 = vcmask 58368  }
  0x13   :  { %s33_s19 = sshll.u32 %s95_s18, 4  ;;  %vm22_vm1 = vcmp.ge.s32.totalorder %v21_v0, 0  ;;  %v96_v1 = vmov 0.0   ;;  %s34_s19 = int_to_ptr.vmem [resolvable:$true] %s33_s19 }
  0x14   :  { %v42_v2 = vsel %vm22_vm1, 1.0, %v96_v1  ;;  %s68_s20 = scalar_lea.vmem %s34_s19, 32  ;;  %p73_p9 = scmp.lt.s32.totalorder %s34_s19, %s34_s19 }
  0x15   :  { %26 = vst.msk [vmem:[#allocation5] sm:$0x3] %vm25_vm0, %v42_v2  ;;  %p69_p8 = scmp.ne.s32.totalorder %s34_s19, %s68_s20  ;;  %p74_p10 = scmp.lt.s32.totalorder %s68_s20, %s68_s20 }
  0x17   :  { %p75_p11 = por %p74_p10, %p73_p9 }
  0x19   :  { %p76_p12 = pnand %p75_p11, %p69_p8 }
  0x1b   :  { %79 = shalt.err (!%p76_p12)
}
  0x1c   :  { %s80_s22 = scalar_lea.hbm %s132_s1, 32 }
  0x1d   :  { %p81_p13 = scmp.ne.s32.totalorder %s132_s1, %s80_s22  ;;  %p84_p0 = scmp.lt.u32.totalorder %s80_s22, %s132_s1 }
  0x1f   :  { %p86_p1 = pnand %p84_p0, %p81_p13 }
  0x21   :  { %89 = shalt.err (!%p86_p1)
}
  0x22   :  { %36 = dma.vmem_to_hbm [thread:$0]  %s34_s19, 32, %s132_s1, [#allocation4]  }
  0x23   :  { %92 = dma.done.wait [#allocation4], 32  }
  0x24   :  { %93 = vsyncadd [#allocation4], 4294967264 }
  0x25   :  { %40 = vsyncpa [#allocation3], 1 }
  0x26   :  { %41 = vsyncpa [#allocation4], 1 }

</bundles_post_ra>
